<compile_context>
chip_gen: v7x
topology: tpu7x:2x2x1
jax: 0.10.0
libtpu: 0.0.40
codegen_flags: <defaults>
</compile_context>

<pallas_src>
import jax
import jax.numpy as jnp
from jax.experimental import pallas as pl
from jax.experimental.pallas import tpu as pltpu  # noqa: F401  (TPU backend)


# ------------------------------- model dims ---------------------------------

CIN, C_STEM, C_FEAT, NUM_CLASSES = 3, 16, 32, 2
KSIZE, STRIDE, PAD = 3, 2, 1
K_DIM = KSIZE * KSIZE * CIN          # 27
K_PAD = 32                           # GEMM K padded to a multiple of 8


# ----------------------------- fused Pallas kernel --------------------------

def _fused_forward_kernel(patches_t_ref, w_stem_t_ref, scale_stem_ref,
                          bias_stem_ref, w_pw_t_ref, scale_pw_ref, bias_pw_ref,
                          w_cls_t_ref, b_cls_ref, pool_ref,
                          feat_t_ref, head_ref):
    """Whole forward, channels-first (lane-dense) layout.

    patches_t : [K_pad, M]        bf16  transposed im2col patches (M = N*Ho*Wo)
    w_stem_t  : [C_stem, K_pad]   bf16  stem conv weight (transposed GEMM form)
    w_pw_t    : [C_feat, C_stem]  bf16  pointwise conv weight
    scale/bias: [C, 1]            f32   folded-BN affines (broadcast over lanes)
    w_cls_t   : [NC, C_feat] f32, b_cls: [NC, 1] f32
    pool      : [M, N]            f32   GAP expressed as a matmul
    feat_t    : [C_feat, M]       f32   lane-dense feature map (output)
    head      : [8, 128]          f32   rows 0..NC-1: logits^T, row NC: prob
    """
    # --- stem conv (3x3/s2) as GEMM + BN + SiLU: [C_stem, M] -----------------
    y = jnp.dot(w_stem_t_ref[...], patches_t_ref[...],
                preferred_element_type=jnp.float32)
    y = y * scale_stem_ref[...] + bias_stem_ref[...]
    stem_t = y * pl.reciprocal(1.0 + jnp.exp(-y), approx=True)      # SiLU (EUP)

    # --- pointwise (1x1) conv + BN + SiLU: [C_feat, M] -----------------------
    z = jnp.dot(w_pw_t_ref[...], stem_t.astype(jnp.bfloat16),
                preferred_element_type=jnp.float32)
    z = z * scale_pw_ref[...] + bias_pw_ref[...]
    feat_t = z * pl.reciprocal(1.0 + jnp.exp(-z), approx=True)
    feat_t_ref[...] = feat_t               # single unmasked lane-dense store

    # --- classifier head: GAP (as matmul) + linear + softmax -----------------
    pooled_t = jnp.dot(feat_t, pool_ref[...],
                       preferred_element_type=jnp.float32)          # [C_feat, N]
    logits_t = jnp.dot(w_cls_t_ref[...], pooled_t,
                       preferred_element_type=jnp.float32) + b_cls_ref[...]

    # softmax over the 2 classes, elementwise (no cross-sublane reduce needed)
    l0 = logits_t[0:1, :]
    l1 = logits_t[1:2, :]
    m = jnp.maximum(l0, l1)
    e0 = jnp.exp(l0 - m)
    e1 = jnp.exp(l1 - m)
    prob1 = e1 / (e0 + e1)                 # P(class 1), matches softmax[:, 1]

    n = logits_t.shape[1]
    head_ref[...] = jnp.zeros_like(head_ref)
    head_ref[0:NUM_CLASSES, 0:n] = logits_t
    head_ref[NUM_CLASSES:NUM_CLASSES + 1, 0:n] = prob1


def _fused_forward(patches_t, pool_mat, params):
    c_feat = params["w_pw_t"].shape[0]
    m = patches_t.shape[1]
    # Single invocation, no grid: the whole working set (< 64 KiB) is VMEM
    # resident on every TPU generation, so BlockSpec tiling is unnecessary.
    # TODO(synk): at real EfficientNet-B4 sizes (380x380 -> M ~ N*190*190) add a
    # BlockSpec grid over M marked "parallel" and re-derive tiles for v7x's
    # 64 MiB VMEM / 2 TensorCores.
    return pl.pallas_call(
        _fused_forward_kernel,
        out_shape=(
            jax.ShapeDtypeStruct((c_feat, m), jnp.float32),   # feat^T, lane-dense
            jax.ShapeDtypeStruct((8, 128), jnp.float32),      # packed head slab
        ),
    )(patches_t, params["w_stem_t"], params["scale_stem"], params["bias_stem"],
      params["w_pw_t"], params["scale_pw"], params["bias_pw"],
      params["w_cls_t"], params["b_cls"], pool_mat)


# --------------------------------- glue --------------------------------------

def _im2col_transposed(x_nhwc, ksize, stride, pad, k_pad):
    """Transposed im2col: returns a lane-dense [k_pad, N*Ho*Wo] patch matrix."""
    N, H, W, C = x_nhwc.shape
    xp = jnp.pad(x_nhwc, ((0, 0), (pad, pad), (pad, pad), (0, 0)))
    Ho = (H + 2 * pad - ksize) // stride + 1
    Wo = (W + 2 * pad - ksize) // stride + 1
    taps = []
    for i in range(ksize):
        for j in range(ksize):
            taps.append(xp[:, i:i + stride * Ho:stride,
                           j:j + stride * Wo:stride, :])
    pt = jnp.stack(taps, axis=0)                        # [k*k, N, Ho, Wo, C]
    pt = jnp.transpose(pt, (0, 4, 1, 2, 3))             # [k*k, C, N, Ho, Wo]
    pt = pt.reshape(ksize * ksize * C, N * Ho * Wo)     # [K, M]
    pt = jnp.pad(pt, ((0, k_pad - ksize * ksize * C), (0, 0)))
    return pt, (Ho, Wo)


def init_params(key):
    """Deterministic synthetic parameters (transposed GEMM layouts)."""
    ks = jax.random.split(key, 8)
    w_stem_t = jax.random.normal(ks[0], (C_STEM, K_PAD), jnp.float32) * 0.1
    w_stem_t = w_stem_t.at[:, K_DIM:].set(0.0)          # padded-K columns zero
    return {
        "w_stem_t": w_stem_t.astype(jnp.bfloat16),                       # [16, 32]
        "scale_stem": 1.0 + 0.1 * jax.random.normal(ks[1], (C_STEM, 1), jnp.float32),
        "bias_stem": 0.1 * jax.random.normal(ks[2], (C_STEM, 1), jnp.float32),
        "w_pw_t": (jax.random.normal(ks[3], (C_FEAT, C_STEM), jnp.float32)
                   * 0.1).astype(jnp.bfloat16),                          # [32, 16]
        "scale_pw": 1.0 + 0.1 * jax.random.normal(ks[4], (C_FEAT, 1), jnp.float32),
        "bias_pw": 0.1 * jax.random.normal(ks[5], (C_FEAT, 1), jnp.float32),
        "w_cls_t": jax.random.normal(ks[6], (NUM_CLASSES, C_FEAT), jnp.float32) * 0.1,
        "b_cls": 0.1 * jax.random.normal(ks[7], (NUM_CLASSES, 1), jnp.float32),
    }


def efficientnetb4_detector_forward(x_nchw, params):
    """Mirrors Efficientnetb4_Detector.forward: returns {'cls','prob','feat'}."""
    N = x_nchw.shape[0]
    x_nhwc = jnp.transpose(x_nchw, (0, 2, 3, 1)).astype(jnp.float32)

    patches_t, (Ho, Wo) = _im2col_transposed(x_nhwc, KSIZE, STRIDE, PAD, K_PAD)
    S = Ho * Wo
    # GAP as a matmul: pool[m, n] = 1/S iff patch row m belongs to sample n.
    pool_mat = jnp.repeat(jnp.eye(N, dtype=jnp.float32), S, axis=0) / float(S)

    feat_t, head = _fused_forward(patches_t.astype(jnp.bfloat16), pool_mat, params)

    c_feat = feat_t.shape[0]
    feat_nchw = jnp.transpose(feat_t.reshape(c_feat, N, Ho, Wo), (1, 0, 2, 3))
    cls = jnp.transpose(head[0:NUM_CLASSES, 0:N])       # [N, NUM_CLASSES]
    prob = head[NUM_CLASSES, 0:N]                       # [N] = softmax(cls)[:, 1]
    return {"cls": cls, "prob": prob, "feat": feat_nchw}


# ---------------------------------- main --------------------------------------

if __name__ == "__main__":
    key = jax.random.PRNGKey(0)
    k_x, k_p = jax.random.split(key)

    # small, EfficientNet-consistent input: NCHW, 3-channel RGB
    x = jax.random.normal(k_x, (2, CIN, 16, 16), jnp.float32)
    params = init_params(k_p)

    fwd = jax.jit(efficientnetb4_detector_forward)
    out = fwd(x, params)
    jax.block_until_ready(out)

    assert out["cls"].shape == (2, NUM_CLASSES)
    assert out["prob"].shape == (2,)
    assert out["feat"].shape == (2, C_FEAT, 8, 8)
    # softmax sanity: prob returned by the kernel == softmax(cls)[:, 1]
    ref_prob = jax.nn.softmax(out["cls"], axis=1)[:, 1]
    assert jnp.allclose(out["prob"], ref_prob, atol=1e-5)
    assert bool(jnp.isfinite(out["feat"]).all())

    print("KERNEL_OK")
</pallas_src>

<mosaic_0001>
module attributes {stable_mosaic.version = 11 : i64} {
  func.func @_fused_forward_kernel(%arg0: memref<32x128xbf16, #tpu.memory_space<vmem>>, %arg1: memref<16x32xbf16, #tpu.memory_space<vmem>>, %arg2: memref<16x1xf32, #tpu.memory_space<vmem>>, %arg3: memref<16x1xf32, #tpu.memory_space<vmem>>, %arg4: memref<32x16xbf16, #tpu.memory_space<vmem>>, %arg5: memref<32x1xf32, #tpu.memory_space<vmem>>, %arg6: memref<32x1xf32, #tpu.memory_space<vmem>>, %arg7: memref<2x32xf32, #tpu.memory_space<vmem>>, %arg8: memref<2x1xf32, #tpu.memory_space<vmem>>, %arg9: memref<128x2xf32, #tpu.memory_space<vmem>>, %arg10: memref<32x128xf32, #tpu.memory_space<vmem>>, %arg11: memref<8x128xf32, #tpu.memory_space<vmem>>) attributes {dimension_semantics = [], scalar_prefetch = 0 : i64, scratch_operands = 0 : i64, tpu.core_type = #tpu.core_type<tc>} {
    %c0 = arith.constant 0 : index
    %c0_0 = arith.constant 0 : index
    %0 = vector.load %arg1[%c0, %c0_0] : memref<16x32xbf16, #tpu.memory_space<vmem>>, vector<16x32xbf16>
    %c0_1 = arith.constant 0 : index
    %c0_2 = arith.constant 0 : index
    %1 = vector.load %arg0[%c0_1, %c0_2] : memref<32x128xbf16, #tpu.memory_space<vmem>>, vector<32x128xbf16>
    %cst = arith.constant dense<0.000000e+00> : vector<16x128xf32>
    %2 = tpu.matmul %0, %1, %cst {dimension_numbers = #tpu.dot_dimension_numbers<[1], [0], [0], [1], [0, 0, 1, 1], [], []>} : vector<16x32xbf16>, vector<32x128xbf16>, vector<16x128xf32> -> vector<16x128xf32>
    %c0_3 = arith.constant 0 : index
    %c0_4 = arith.constant 0 : index
    %3 = vector.load %arg2[%c0_3, %c0_4] : memref<16x1xf32, #tpu.memory_space<vmem>>, vector<16x1xf32>
    %4 = vector.broadcast %3 : vector<16x1xf32> to vector<16x128xf32>
    %5 = arith.mulf %2, %4 : vector<16x128xf32>
    %c0_5 = arith.constant 0 : index
    %c0_6 = arith.constant 0 : index
    %6 = vector.load %arg3[%c0_5, %c0_6] : memref<16x1xf32, #tpu.memory_space<vmem>>, vector<16x1xf32>
    %7 = vector.broadcast %6 : vector<16x1xf32> to vector<16x128xf32>
    %8 = arith.addf %5, %7 : vector<16x128xf32>
    %cst_7 = arith.constant 0.000000e+00 : f32
    %9 = vector.broadcast %cst_7 : f32 to vector<16x128xf32>
    %10 = arith.subf %9, %8 : vector<16x128xf32>
    %11 = math.exp %10 : vector<16x128xf32>
    %cst_8 = arith.constant 1.000000e+00 : f32
    %12 = vector.broadcast %cst_8 : f32 to vector<16x128xf32>
    %13 = arith.addf %12, %11 : vector<16x128xf32>
    %14 = tpu.reciprocal %13 {approx = true} : vector<16x128xf32> -> vector<16x128xf32>
    %15 = arith.mulf %8, %14 : vector<16x128xf32>
    %c0_9 = arith.constant 0 : index
    %c0_10 = arith.constant 0 : index
    %16 = vector.load %arg4[%c0_9, %c0_10] : memref<32x16xbf16, #tpu.memory_space<vmem>>, vector<32x16xbf16>
    %17 = arith.truncf %15 : vector<16x128xf32> to vector<16x128xbf16>
    %cst_11 = arith.constant dense<0.000000e+00> : vector<32x128xf32>
    %18 = tpu.matmul %16, %17, %cst_11 {dimension_numbers = #tpu.dot_dimension_numbers<[1], [0], [0], [1], [0, 0, 1, 1], [], []>} : vector<32x16xbf16>, vector<16x128xbf16>, vector<32x128xf32> -> vector<32x128xf32>
    %c0_12 = arith.constant 0 : index
    %c0_13 = arith.constant 0 : index
    %19 = vector.load %arg5[%c0_12, %c0_13] : memref<32x1xf32, #tpu.memory_space<vmem>>, vector<32x1xf32>
    %20 = vector.broadcast %19 : vector<32x1xf32> to vector<32x128xf32>
    %21 = arith.mulf %18, %20 : vector<32x128xf32>
    %c0_14 = arith.constant 0 : index
    %c0_15 = arith.constant 0 : index
    %22 = vector.load %arg6[%c0_14, %c0_15] : memref<32x1xf32, #tpu.memory_space<vmem>>, vector<32x1xf32>
    %23 = vector.broadcast %22 : vector<32x1xf32> to vector<32x128xf32>
    %24 = arith.addf %21, %23 : vector<32x128xf32>
    %cst_16 = arith.constant 0.000000e+00 : f32
    %25 = vector.broadcast %cst_16 : f32 to vector<32x128xf32>
    %26 = arith.subf %25, %24 : vector<32x128xf32>
    %27 = math.exp %26 : vector<32x128xf32>
    %cst_17 = arith.constant 1.000000e+00 : f32
    %28 = vector.broadcast %cst_17 : f32 to vector<32x128xf32>
    %29 = arith.addf %28, %27 : vector<32x128xf32>
    %30 = tpu.reciprocal %29 {approx = true} : vector<32x128xf32> -> vector<32x128xf32>
    %31 = arith.mulf %24, %30 : vector<32x128xf32>
    %c0_18 = arith.constant 0 : index
    %c0_19 = arith.constant 0 : index
    %32 = vector.load %arg10[%c0_18, %c0_19] : memref<32x128xf32, #tpu.memory_space<vmem>>, vector<32x128xf32>
    tpu.vector_store %arg10[%c0_18, %c0_19], %31 {strides = array<i32>} : memref<32x128xf32, #tpu.memory_space<vmem>>, vector<32x128xf32>,
    %c0_20 = arith.constant 0 : index
    %c0_21 = arith.constant 0 : index
    %33 = vector.load %arg9[%c0_20, %c0_21] : memref<128x2xf32, #tpu.memory_space<vmem>>, vector<128x2xf32>
    %cst_22 = arith.constant dense<0.000000e+00> : vector<32x2xf32>
    %34 = tpu.matmul %31, %33, %cst_22 {dimension_numbers = #tpu.dot_dimension_numbers<[1], [0], [0], [1], [0, 0, 1, 1], [], []>} : vector<32x128xf32>, vector<128x2xf32>, vector<32x2xf32> -> vector<32x2xf32>
    %c0_23 = arith.constant 0 : index
    %c0_24 = arith.constant 0 : index
    %35 = vector.load %arg7[%c0_23, %c0_24] : memref<2x32xf32, #tpu.memory_space<vmem>>, vector<2x32xf32>
    %cst_25 = arith.constant dense<0.000000e+00> : vector<2x2xf32>
    %36 = tpu.matmul %35, %34, %cst_25 {dimension_numbers = #tpu.dot_dimension_numbers<[1], [0], [0], [1], [0, 0, 1, 1], [], []>} : vector<2x32xf32>, vector<32x2xf32>, vector<2x2xf32> -> vector<2x2xf32>
    %c0_26 = arith.constant 0 : index
    %c0_27 = arith.constant 0 : index
    %37 = vector.load %arg8[%c0_26, %c0_27] : memref<2x1xf32, #tpu.memory_space<vmem>>, vector<2x1xf32>
    %38 = vector.broadcast %37 : vector<2x1xf32> to vector<2x2xf32>
    %39 = arith.addf %36, %38 : vector<2x2xf32>
    %40 = vector.extract_strided_slice %39 {offsets = [0, 0], sizes = [1, 2], strides = [1, 1]} : vector<2x2xf32> to vector<1x2xf32>
    %41 = vector.extract_strided_slice %39 {offsets = [1, 0], sizes = [1, 2], strides = [1, 1]} : vector<2x2xf32> to vector<1x2xf32>
    %42 = arith.maximumf %40, %41 : vector<1x2xf32>
    %43 = arith.subf %40, %42 : vector<1x2xf32>
    %44 = math.exp %43 : vector<1x2xf32>
    %45 = arith.subf %41, %42 : vector<1x2xf32>
    %46 = math.exp %45 : vector<1x2xf32>
    %47 = arith.addf %44, %46 : vector<1x2xf32>
    %48 = arith.divf %46, %47 : vector<1x2xf32>
    %cst_28 = arith.constant 0.000000e+00 : f32
    %49 = vector.broadcast %cst_28 : f32 to vector<8x128xf32>
    %c0_29 = arith.constant 0 : index
    %c0_30 = arith.constant 0 : index
    %50 = vector.load %arg11[%c0_29, %c0_30] : memref<8x128xf32, #tpu.memory_space<vmem>>, vector<8x128xf32>
    tpu.vector_store %arg11[%c0_29, %c0_30], %49 {strides = array<i32>} : memref<8x128xf32, #tpu.memory_space<vmem>>, vector<8x128xf32>,
    %c0_31 = arith.constant 0 : index
    %c0_32 = arith.constant 0 : index
    %51 = vector.load %arg11[%c0_31, %c0_32] : memref<8x128xf32, #tpu.memory_space<vmem>>, vector<2x2xf32>
    tpu.vector_store %arg11[%c0_31, %c0_32], %39 {strides = array<i32>} : memref<8x128xf32, #tpu.memory_space<vmem>>, vector<2x2xf32>,
    %c2 = arith.constant 2 : index
    %c0_33 = arith.constant 0 : index
    %52 = vector.load %arg11[%c2, %c0_33] : memref<8x128xf32, #tpu.memory_space<vmem>>, vector<1x2xf32>
    tpu.vector_store %arg11[%c2, %c0_33], %48 {strides = array<i32>} : memref<8x128xf32, #tpu.memory_space<vmem>>, vector<1x2xf32>,
    return
  }
}

</mosaic_0001>

<bundles_post_ra>
// kernel: efficientnetb4_detector_forward.1
= control target key start
LH: loop header
LB: loop body
LE: loop exit
PB: predicated region body
PF: predicated region fallthrough
CT: control target
= control target key end

     0   :  { %v699_v0 = vmov 0.0   ;;  %vm700_vm0 = vmmov 0   ;;  %v701_v2 = vmov 0   ;;  %vm61_vm1 = vcmask 261120   ;;  %s900_s11 = inlined_call_operand.vmem [shape: f32[8,128], index: 11, kind: output, shape index: {1}]   ;;  %s901_s0 = inlined_call_operand.vmem [shape: bf16[32,128], index: 0, kind: input, shape index: {}]   ;;  %s902_s2 = inlined_call_operand.vmem [shape: f32[16,1], index: 2, kind: input, shape index: {}]   ;;  %s903_s3 = inlined_call_operand.vmem [shape: f32[16,1], index: 3, kind: input, shape index: {}]   ;;  %s904_s1 = inlined_call_operand.vmem [shape: bf16[16,32], index: 1, kind: input, shape index: {}]   ;;  %s905_s5 = inlined_call_operand.vmem [shape: f32[32,1], index: 5, kind: input, shape index: {}]   ;;  %s906_s6 = inlined_call_operand.vmem [shape: f32[32,1], index: 6, kind: input, shape index: {}]   ;;  %s907_s8 = inlined_call_operand.vmem [shape: f32[2,1], index: 8, kind: input, shape index: {}]   ;;  %s908_s4 = inlined_call_operand.vmem [shape: bf16[32,16], index: 4, kind: input, shape index: {}]   ;;  %s909_s9 = inlined_call_operand.vmem [shape: f32[128,2], index: 9, kind: input, shape index: {}]   ;;  %s910_s10 = inlined_call_operand.vmem [shape: f32[32,128], index: 10, kind: output, shape index: {0}]   ;;  %s911_s7 = inlined_call_operand.vmem [shape: f32[2,32], index: 7, kind: input, shape index: {}]  }
   0x1   :  { %557 = vmatprep.subr.bf16.mxu0 %v699_v0  ;;  %504 = vst [vmem:[%s900_s11] sm:$0xff] %v699_v0  ;;  %v664_v1 = vld [vmem:[%s901_s0] sm:$0xff]   ;;  %561 = vmatprep.mubr.msk.bf16.mxu0 %vm700_vm0, %v699_v0  ;;  %v665_v3 = vld [vmem:[%s901_s0 + $0x8] sm:$0xff]   ;;  %v219_v13 = vld [vmem:[%s905_s5 + $0x10] sm:$0xff]  ;;  %vm161_vm2 = vcmask 130048   ;;  %vm505_vm3 = vcmask 9216   ;;  %vm507_vm4 = vcmask 9217  }
   0x2   :  { %662 = vset.pattern.permute.xlu0 %v701_v2  ;;  %663 = vset.pattern.permute.xlu1 %v701_v2  ;;  %v106_v4 = vld [vmem:[%s902_s2] sm:$0xff]  ;;  %v107_v7 = vld [vmem:[%s902_s2 + $0x8] sm:$0xff]  ;;  %v220_v14 = vld [vmem:[%s905_s5 + $0x18] sm:$0xff] }
   0x3   :  { %558 = vmatpush3.bf16.msra.mxu0 %v664_v1  ;;  %v120_v5 = vld [vmem:[%s903_s3] sm:$0xff]  ;;  %110 = vperm.xlu0 %662, %v106_v4   ;;  %v121_v8 = vld [vmem:[%s903_s3 + $0x8] sm:$0xff]  ;;  %v247_v15 = vld [vmem:[%s906_s6 + $0x10] sm:$0xff] }
   0x4   :  { %559 = vmatprep.subr.bf16.mxu0 %v699_v0  ;;  %124 = vperm.xlu1 %663, %v120_v5   ;;  %v666_v6 = vld [vmem:[%s904_s1] sm:$0xff]   ;;  %v218_v10 = vld [vmem:[%s905_s5 + $0x8] sm:$0xff]  ;;  %v248_v16 = vld [vmem:[%s906_s6 + $0x18] sm:$0xff] }
   0x5   :  { %v217_v9 = vld [vmem:[%s905_s5] sm:$0xff]  ;;  %v246_v12 = vld [vmem:[%s906_s6 + $0x8] sm:$0xff]  ;;  %v303_v48 = vld [vmem:[%s909_s9 + $0x10] sm:$0xff] }
   0x6   :  { %v245_v11 = vld [vmem:[%s906_s6] sm:$0xff]  ;;  %v668_v44 = vld [vmem:[%s908_s4 + $0x8] sm:$0xff]   ;;  %v304_v49 = vld [vmem:[%s909_s9 + $0x18] sm:$0xff] }
   0x7   :  { %560 = vmatpush3.bf16.msra.mxu0 %v665_v3  ;;  %115 = vperm.xlu0 %662, %v107_v7   ;;  %v403_v17 = vld [vmem:[%s907_s8] sm:$0x3]  ;;  %v302_v46 = vld [vmem:[%s909_s9 + $0x8] sm:$0xff]  ;;  %v624_v50 = vpack.c.bf16 %v304_v49, %v303_v48  ;;  %v307_v54 = vld [vmem:[%s909_s9 + $0x30] sm:$0xff]  ;;  %v702_v49 = vmov 0.0|0.0  }
   0x8   :  { %129 = vperm.xlu1 %663, %v121_v8   ;;  %v667_v18 = vld [vmem:[%s908_s4] sm:$0xff]   ;;  %v306_v52 = vld [vmem:[%s909_s9 + $0x28] sm:$0xff]  ;;  %v308_v55 = vld [vmem:[%s909_s9 + $0x38] sm:$0xff] }
   0x9   :  { %v301_v45 = vld [vmem:[%s909_s9] sm:$0xff]  ;;  %v632_v56 = vpack.c.bf16 %v308_v55, %v307_v54  ;;  %v310_v58 = vld [vmem:[%s909_s9 + $0x48] sm:$0xff]  ;;  %v311_v60 = vld [vmem:[%s909_s9 + $0x50] sm:$0xff] }
   0xa   :  { %562 = vmatmul.mubr.msk.bf16.vlgmr.msra.gmra.mrb[0].mxu0 %vm61_vm1, %v666_v6  ;;  %v620_v47 = vpack.c.bf16 %v302_v46, %v301_v45  ;;  %v305_v51 = vld [vmem:[%s909_s9 + $0x20] sm:$0xff]  ;;  %v312_v61 = vld [vmem:[%s909_s9 + $0x58] sm:$0xff]  ;;  %v315_v1 = vld [vmem:[%s909_s9 + $0x70] sm:$0xff] }
   0xb   :  { %223 = vperm.xlu0 %662, %v217_v9   ;;  %567 = vmatprep.mubr.msk.bf16.mxu0 %vm161_vm2, %v667_v18  ;;  %v628_v53 = vpack.c.bf16 %v306_v52, %v305_v51  ;;  %v309_v57 = vld [vmem:[%s909_s9 + $0x40] sm:$0xff]  ;;  %v640_v62 = vpack.c.bf16 %v312_v61, %v311_v60  ;;  %v316_v3 = vld [vmem:[%s909_s9 + $0x78] sm:$0xff] }
   0xc   :  { %228 = vperm.xlu1 %663, %v218_v10   ;;  %621 = vmatprep.subr.bf16.mxu1 %v620_v47  ;;  %v636_v59 = vpack.c.bf16 %v310_v58, %v309_v57  ;;  %v313_v63 = vld [vmem:[%s909_s9 + $0x60] sm:$0xff]  ;;  %v648_v4 = vpack.c.bf16 %v316_v3, %v315_v1 }
   0xd   :  { %623 = vmatpush3.bf16.msra.mxu1 %v620_v47 }
   0xe   :  { %625 = vmatprep.subr.bf16.mxu1 %v624_v50 }
   0xf   :  { %251 = vperm.xlu0 %662, %v245_v11  }
  0x10   :  { %256 = vperm.xlu1 %663, %v246_v12  }
  0x11   :  { %627 = vmatpush3.bf16.msra.mxu1 %v624_v50 }
  0x12   :  { %629 = vmatprep.subr.bf16.mxu1 %v628_v53 }
  0x13   :  { %233 = vperm.xlu0 %662, %v219_v13  }
  0x14   :  { %238 = vperm.xlu1 %663, %v220_v14  }
  0x15   :  { %631 = vmatpush3.bf16.msra.mxu1 %v628_v53 }
  0x16   :  { %633 = vmatprep.subr.bf16.mxu1 %v632_v56 }
  0x17   :  { %261 = vperm.xlu0 %662, %v247_v15  }
  0x18   :  { %266 = vperm.xlu1 %663, %v248_v16  }
  0x19   :  { %635 = vmatpush3.bf16.msra.mxu1 %v632_v56  ;;  %v402_v56 = vld [vmem:[%s911_s7] sm:$0x3] }
  0x1a   :  { %637 = vmatprep.subr.bf16.mxu1 %v636_v59 }
  0x1b   :  { %406 = vperm.xlu0 %662, %v403_v17  }
  0x1d   :  { %639 = vmatpush3.bf16.msra.mxu1 %v636_v59 }
  0x1e   :  { %641 = vmatprep.subr.bf16.mxu1 %v640_v62 }
  0x21   :  { %643 = vmatpush3.bf16.msra.mxu1 %v640_v62 }
  0x82   :  { %v111_v19 = vpop.permute.xlu0 %110 }
  0x83   :  { %v125_v20 = vpop.permute.xlu1 %124 }
  0x86   :  { %v116_v24 = vpop.permute.xlu0 %115 }
  0x87   :  { %v130_v29 = vpop.permute.xlu1 %129 }
  0x8a   :  { %v224_v5 = vpop.permute.xlu0 %223 }
  0x8b   :  { %v229_v6 = vpop.permute.xlu1 %228 }
  0x8e   :  { %v252_v7 = vpop.permute.xlu0 %251 }
  0x8f   :  { %v257_v8 = vpop.permute.xlu1 %256 }
  0x92   :  { %v234_v9 = vpop.permute.xlu0 %233 }
  0x93   :  { %v239_v10 = vpop.permute.xlu1 %238 }
  0x96   :  { %v262_v14 = vpop.permute.xlu0 %261 }
  0x9a   :  { %v407_v57 = vpop.permute.xlu0 %406 }
  0xdd   :  { %v99_v21 = vpop.f32.mrb[0].mxu0 }
  0xde   :  { %v118_v22 = vmul.f32 %v111_v19, %v99_v21  ;;  %v563_v23 = vpop.f32.mrb[1].mxu0 }
  0xdf   :  { %v102_v25 = vpop.f32.mrb[2].mxu0 }
  0xe0   :  { %v132_v26 = vadd.f32 %v125_v20, %v118_v22  ;;  %v119_v27 = vmul.f32 %v116_v24, %v102_v25  ;;  %v564_v28 = vpop.f32.mrb[3].mxu0  ;;  %v267_v20 = vpop.permute.xlu1 %266 }
  0xe2   :  { %v134_v30 = vsub.f32 0.0, %v132_v26  ;;  %v133_v31 = vadd.f32 %v130_v29, %v119_v27 }
  0xe4   :  { %v136_v32 = vmul.f32 1.442695, %v134_v30  ;;  %v135_v33 = vsub.f32 0.0, %v133_v31 }
  0xe6   :  { %669 = vpow2.f32 %v136_v32  ;;  %v138_v34 = vmul.f32 1.442695, %v135_v33 }
  0xe8   :  { %671 = vpow2.f32 %v138_v34 }
  0xf0   :  { %v670_v35 = vpop.eup %669 }
  0xf1   :  { %v140_v36 = vadd.f32 1.0, %v670_v35 }
  0xf2   :  { %v672_v37 = vpop.eup %671 }
  0xf3   :  { %673 = vrcp.f32 %v140_v36  ;;  %v141_v38 = vadd.f32 1.0, %v672_v37 }
  0xf5   :  { %675 = vrcp.f32 %v141_v38 }
  0xfd   :  { %v674_v39 = vpop.eup %673 }
  0xfe   :  { %v144_v41 = vmul.f32 %v674_v39, %v132_v26 }
  0xff   :  { %v676_v40 = vpop.eup %675 }
 0x100   :  { %v145_v42 = vmul.f32 %v676_v40, %v133_v31 }
 0x102   :  { %v150_v43 = vpack.c.bf16 %v145_v42, %v144_v41 }
 0x104   :  { %565 = vmatprep.subr.bf16.mxu0 %v150_v43 }
 0x105   :  { %566 = vmatpush3.bf16.msra.mxu0 %v150_v43 }
 0x106   :  { %652 = vmatprep.subr.bf16.mxu0 %v702_v49 }
 0x108   :  { %568 = vmatmul.mubr.msk.bf16.vlgmr.msra.gmra.mrb[4].mxu0 %vm161_vm2, %v668_v44 }
 0x109   :  { %617 = vmatprep.mubr.msk.f32.mxu0 %vm700_vm0, %v699_v0  ;;  %v314_v0 = vld [vmem:[%s909_s9 + $0x68] sm:$0xff] }
 0x10a   :  { %v644_v2 = vpack.c.bf16 %v314_v0, %v313_v63 }
 0x10c   :  { %645 = vmatprep.subr.bf16.mxu1 %v644_v2 }
 0x10d   :  { %647 = vmatpush3.bf16.msra.mxu1 %v644_v2 }
 0x10e   :  { %649 = vmatprep.subr.bf16.mxu1 %v648_v4 }
 0x111   :  { %651 = vmatpush3.bf16.msra.mxu1 %v648_v4 }
 0x1db   :  { %v569_v11 = vpop.f32.mrb[4].mxu0 }
 0x1dc   :  { %v243_v12 = vmul.f32 %v569_v11, %v234_v9  ;;  %v202_v13 = vpop.f32.mrb[5].mxu0 }
 0x1dd   :  { %v241_v15 = vmul.f32 %v224_v5, %v202_v13  ;;  %v570_v16 = vpop.f32.mrb[6].mxu0 }
 0x1de   :  { %v271_v17 = vadd.f32 %v262_v14, %v243_v12  ;;  %v244_v18 = vmul.f32 %v570_v16, %v239_v10  ;;  %v205_v19 = vpop.f32.mrb[7].mxu0 }
 0x1df   :  { %v269_v21 = vadd.f32 %v252_v7, %v241_v15  ;;  %v242_v22 = vmul.f32 %v229_v6, %v205_v19 }
 0x1e0   :  { %v275_v23 = vsub.f32 0.0, %v271_v17  ;;  %v272_v24 = vadd.f32 %v267_v20, %v244_v18 }
 0x1e1   :  { %v273_v25 = vsub.f32 0.0, %v269_v21  ;;  %v270_v26 = vadd.f32 %v257_v8, %v242_v22 }
 0x1e2   :  { %v281_v27 = vmul.f32 1.442695, %v275_v23  ;;  %v276_v28 = vsub.f32 0.0, %v272_v24 }
 0x1e3   :  { %v277_v29 = vmul.f32 1.442695, %v273_v25  ;;  %v274_v30 = vsub.f32 0.0, %v270_v26 }
 0x1e4   :  { %677 = vpow2.f32 %v281_v27  ;;  %v283_v31 = vmul.f32 1.442695, %v276_v28 }
 0x1e5   :  { %679 = vpow2.f32 %v277_v29  ;;  %v279_v32 = vmul.f32 1.442695, %v274_v30 }
 0x1e6   :  { %681 = vpow2.f32 %v283_v31 }
 0x1e7   :  { %683 = vpow2.f32 %v279_v32 }
 0x1ee   :  { %v678_v33 = vpop.eup %677 }
 0x1ef   :  { %v680_v34 = vpop.eup %679  ;;  %v287_v35 = vadd.f32 1.0, %v678_v33 }
 0x1f0   :  { %v682_v36 = vpop.eup %681  ;;  %v285_v37 = vadd.f32 1.0, %v680_v34 }
 0x1f1   :  { %v684_v38 = vpop.eup %683  ;;  %685 = vrcp.f32 %v287_v35  ;;  %v288_v39 = vadd.f32 1.0, %v682_v36 }
 0x1f2   :  { %687 = vrcp.f32 %v285_v37  ;;  %v286_v40 = vadd.f32 1.0, %v684_v38 }
 0x1f3   :  { %689 = vrcp.f32 %v288_v39 }
 0x1f4   :  { %691 = vrcp.f32 %v286_v40 }
 0x1fb   :  { %v686_v41 = vpop.eup %685 }
 0x1fc   :  { %v688_v42 = vpop.eup %687  ;;  %v295_v43 = vmul.f32 %v686_v41, %v271_v17 }
 0x1fd   :  { %v690_v44 = vpop.eup %689  ;;  %v293_v45 = vmul.f32 %v688_v42, %v269_v21 }
 0x1fe   :  { %v692_v46 = vpop.eup %691  ;;  %299 = vst [vmem:[%s910_s10 + $0x10] sm:$0xff] %v295_v43  ;;  %v296_v47 = vmul.f32 %v690_v44, %v272_v24 }
 0x1ff   :  { %297 = vst [vmem:[%s910_s10] sm:$0xff] %v293_v45  ;;  %603 = vmatprep.mubr.f32.mxu1 %v293_v45  ;;  %v294_v48 = vmul.f32 %v692_v46, %v270_v26 }
 0x200   :  { %300 = vst [vmem:[%s910_s10 + $0x18] sm:$0xff] %v296_v47 }
 0x201   :  { %298 = vst [vmem:[%s910_s10 + $0x8] sm:$0xff] %v294_v48  ;;  %604 = vmatmul.mubr.f32.vlgmr.msra.gmra.mrb[0].mxu1 %v294_v48 }
 0x202   :  { %606 = vmatprep.mubr.f32.mxu1 %v295_v43 }
 0x205   :  { %607 = vmatmul.mubr.f32.gmra.mrb[2].mxu1 %v296_v47 }
 0x2d4   :  { %v605_v50 = vpop.f32.mrb[0].mxu1 }
 0x2d5   :  { %v383_v51 = vpop.f32.mrb[1].mxu1 }
 0x2d6   :  { %v653_v52 = vpack.c.bf16 %v605_v50, %v383_v51 }
 0x2d8   :  { %v608_v53 = vpop.f32.mrb[2].mxu1  ;;  %654 = vmatpush3.bf16.msra.mxu0 %v653_v52 }
 0x2d9   :  { %v393_v54 = vpop.f32.mrb[3].mxu1  ;;  %655 = vmatprep.subr.bf16.mxu0 %v702_v49 }
 0x2da   :  { %v656_v55 = vpack.c.bf16 %v608_v53, %v393_v54 }
 0x2dc   :  { %657 = vmatpush3.bf16.msra.mxu0 %v656_v55 }
 0x2df   :  { %618 = vmatmul.mubr.msk.f32.vlgmr.msra.gmra.mrb[8].mxu0 %vm61_vm1, %v402_v56 }
 0x3b2   :  { %v478_v58 = vpop.f32.mrb[8].mxu0 }
 0x3b3   :  { %v479_v59 = vadd.f32 %v478_v58, %v407_v57  ;;  %v619_v60 = vpop.f32.mrb[9].mxu0 }
 0x3b5   :  { %v483_v61 = vrot.slane %v479_v59, 1  ;;  %506 = vst.msk [vmem:[%s900_s11] sm:$0x3] %vm505_vm3, %v479_v59 }
 0x3b7   :  { %v485_v62 = vmax.f32 %v479_v59, %v483_v61 }
 0x3b9   :  { %v486_v63 = vsub.f32 %v479_v59, %v485_v62  ;;  %v490_v0 = vrot.slane %v485_v62, 7 }
 0x3bb   :  { %v492_v1 = vsub.f32 %v479_v59, %v490_v0  ;;  %v487_v2 = vmul.f32 1.442695, %v486_v63 }
 0x3bd   :  { %v493_v3 = vmul.f32 1.442695, %v492_v1 }
 0x3bf   :  { %693 = vpow2.f32 %v493_v3 }
 0x3c0   :  { %695 = vpow2.f32 %v487_v2 }
 0x3c9   :  { %v694_v4 = vpop.eup %693 }
 0x3ca   :  { %v496_v5 = vrot.slane %v694_v4, 1  ;;  %v696_v6 = vpop.eup %695 }
 0x3cc   :  { %v498_v7 = vadd.f32 %v696_v6, %v496_v5 }
 0x3ce   :  { %v500_v8 = vrot.slane %v498_v7, 7 }
 0x3d0   :  { %697 = vrcp.f32 %v500_v8 }
 0x3da   :  { %v698_v9 = vpop.eup %697 }
 0x3db   :  { %v503_v10 = vmul.f32 %v698_v9, %v694_v4 }
 0x3dd   :  { %508 = vst.msk [vmem:[%s900_s11 + $0x1] sm:$0x2] %vm507_vm4, %v503_v10 }

</bundles_post_ra>
